<compile_context>
chip_gen: v7x
topology: tpu7x:2x2x1
jax: 0.10.0
libtpu: 0.0.40
codegen_flags: <defaults>
</compile_context>

<pallas_src>
import functools
import math

import numpy as np
import jax
import jax.numpy as jnp
from jax.experimental import pallas as pl
from jax.experimental.pallas import tpu as pltpu


def _erf(x):
    # Abramowitz & Stegun 7.1.26 rational approximation, |abs error| <= 1.5e-7.
    # Matches nn.GELU's exact erf to far below the test tolerance.
    a1, a2, a3, a4, a5 = (0.254829592, -0.284496736, 1.421413741,
                          -1.453152027, 1.061405429)
    p = 0.3275911
    sgn = jnp.where(x >= 0.0, 1.0, -1.0)
    ax = jnp.abs(x)
    t = 1.0 / (1.0 + p * ax)
    poly = ((((a5 * t + a4) * t + a3) * t + a2) * t + a1) * t
    return sgn * (1.0 - poly * jnp.exp(-ax * ax))


def _gelu_exact(x):
    return 0.5 * x * (1.0 + _erf(x * (1.0 / math.sqrt(2.0))))


def _layernorm(x, gamma, beta, eps=1e-5):
    # Two independent XLU reductions (sum, sum of squares); var = E[x^2] - mu^2.
    inv_d = 1.0 / x.shape[-1]
    mu = jnp.sum(x, axis=-1, keepdims=True) * inv_d
    ex2 = jnp.sum(x * x, axis=-1, keepdims=True) * inv_d
    var = ex2 - mu * mu
    return (x - mu) * jax.lax.rsqrt(var + eps) * gamma + beta


def vit_block_kernel(B, N, H, dh,
                     x_ref, g1_ref, be1_ref, wqkv_ref, bqkv_ref,
                     g2_ref, be2_ref, w1_ref, bm1_ref, w2_ref, bm2_ref,
                     o_ref):
    D = H * dh
    BN = B * N
    x = x_ref[...]                                            # (B*N, D), whole batch

    # ---- norm1 + fused block-diagonal QKV projection (one MXU matmul).
    #      1/sqrt(dh) is already folded into the Q columns of wqkv/bqkv. ----
    xn = _layernorm(x, g1_ref[...], be1_ref[...])
    qkv = jnp.dot(xn, wqkv_ref[...],
                  preferred_element_type=jnp.float32) + bqkv_ref[...]   # (B*N, 3D)
    qkv3 = qkv.reshape(B, N, 3 * D)                           # leading-dim split only

    # ---- per-head attention: batched-over-B einsums; head outputs kept in vregs
    #      and lane-concatenated (== torch.hstack column order), no VMEM scratch.
    heads = []
    for h in range(H):                                        # static unroll, H small
        q = qkv3[:, :, h * dh:(h + 1) * dh]                   # scale pre-folded
        k = qkv3[:, :, D + h * dh:D + (h + 1) * dh]
        v = qkv3[:, :, 2 * D + h * dh:2 * D + (h + 1) * dh]
        s = jnp.einsum('bnd,bmd->bnm', q, k,
                       preferred_element_type=jnp.float32)    # (B, N, N)
        s = s - jnp.max(s, axis=-1, keepdims=True)
        p = jnp.exp(s)
        p = p / jnp.sum(p, axis=-1, keepdims=True)            # exact normalization
        heads.append(jnp.einsum('bnm,bmd->bnd', p, v,
                                preferred_element_type=jnp.float32))   # (B, N, dh)
    attn = heads[0] if H == 1 else jnp.concatenate(heads, axis=-1)     # (B, N, D)

    out1 = x + attn.reshape(BN, D)                            # residual 1

    # ---- norm2 + MLP (Linear -> exact GELU -> Linear) + residual ----
    yn = _layernorm(out1, g2_ref[...], be2_ref[...])
    h1 = jnp.dot(yn, w1_ref[...], preferred_element_type=jnp.float32) + bm1_ref[...]
    h1 = _gelu_exact(h1)
    h2 = jnp.dot(h1, w2_ref[...], preferred_element_type=jnp.float32) + bm2_ref[...]
    o_ref[...] = out1 + h2                                    # the only store


def pack_vit_params(params, n_heads):
    """Host-side, ONE-TIME numpy packing: per-head (dh, dh) Q/K/V projections ->
    a single block-diagonal (D, 3D) weight (Q block pre-scaled by 1/sqrt(dh)),
    so the kernel does a single xn @ W_qkv matmul with no per-head scaling."""
    g1, be1, wq, bq, wk, bk, wv, bv, g2, be2, w1, bm1, w2, bm2 = params
    wq_n, bq_n = np.asarray(wq, np.float32), np.asarray(bq, np.float32)
    wk_n, bk_n = np.asarray(wk, np.float32), np.asarray(bk, np.float32)
    wv_n, bv_n = np.asarray(wv, np.float32), np.asarray(bv, np.float32)
    H, dh, _ = wq_n.shape
    assert H == n_heads
    D = H * dh
    scale = 1.0 / math.sqrt(dh)

    def blockdiag(w):
        m = np.zeros((D, D), np.float32)
        for h in range(H):
            m[h * dh:(h + 1) * dh, h * dh:(h + 1) * dh] = w[h]
        return m

    w_qkv = np.concatenate(
        [blockdiag(wq_n) * scale, blockdiag(wk_n), blockdiag(wv_n)], axis=1)
    b_qkv = np.concatenate(
        [bq_n.reshape(1, D) * scale, bk_n.reshape(1, D), bv_n.reshape(1, D)], axis=1)
    return (g1, be1, jnp.asarray(w_qkv), jnp.asarray(b_qkv),
            g2, be2, w1, bm1, w2, bm2)


def vit_block(x, packed_params, n_heads):
    B, N, D = x.shape
    H = n_heads
    dh = D // H
    BN = B * N
    g1, be1, w_qkv, b_qkv, g2, be2, w1, bm1, w2, bm2 = packed_params

    # Whole problem in one grid-less step; flatten tokens so the dense layers see
    # full (B*N, D) sublane tiles.  (At real ViT sizes one would add a "parallel"
    # token-tile grid axis for megacore; here per-step overhead would dominate.)
    x2d = x.reshape(BN, D)
    kernel = functools.partial(vit_block_kernel, B, N, H, dh)
    kernel_args = (x2d, g1, be1, w_qkv, b_qkv, g2, be2, w1, bm1, w2, bm2)

    dF = w1.shape[1]                                          # mlp hidden (4*D)
    flops = (2 * BN * D * 3 * D                               # fused QKV projection
             + 2 * B * H * N * N * dh * 2                     # scores + AV
             + 2 * BN * D * dF * 2)                           # MLP fc1 + fc2
    transcendentals = B * H * N * N + BN * dF                 # softmax exp + GELU exp
    bytes_accessed = 4 * (sum(int(np.prod(a.shape)) for a in kernel_args) + BN * D)

    vmem_spec = pl.BlockSpec(memory_space=pltpu.MemorySpace.VMEM)
    out2d = pl.pallas_call(
        kernel,
        out_shape=jax.ShapeDtypeStruct((BN, D), jnp.float32),
        in_specs=[vmem_spec] * len(kernel_args),
        out_specs=vmem_spec,
        compiler_params=pltpu.CompilerParams(vmem_limit_bytes=32 * 1024 * 1024),
        cost_estimate=pl.CostEstimate(flops=flops,
                                      transcendentals=transcendentals,
                                      bytes_accessed=bytes_accessed),
    )(*kernel_args)
    return out2d.reshape(B, N, D)


def _ref(x, params, n_heads):
    """Pure-JAX reference (exact erf GELU) for correctness checking."""
    g1, be1, wq, bq, wk, bk, wv, bv, g2, be2, w1, bm1, w2, bm2 = params
    D = x.shape[-1]
    dh = D // n_heads

    def ln(z, g, b, eps=1e-5):
        mu = jnp.mean(z, axis=-1, keepdims=True)
        var = jnp.mean((z - mu) ** 2, axis=-1, keepdims=True)
        return (z - mu) / jnp.sqrt(var + eps) * g + b

    xn = ln(x, g1, be1)
    heads = []
    for h in range(n_heads):
        seq = xn[:, :, h * dh:(h + 1) * dh]
        q = seq @ wq[h] + bq[h]
        k = seq @ wk[h] + bk[h]
        v = seq @ wv[h] + bv[h]
        att = jax.nn.softmax(jnp.einsum('bnd,bmd->bnm', q, k) / dh ** 0.5, axis=-1)
        heads.append(jnp.einsum('bnm,bmd->bnd', att, v))
    out1 = x + jnp.concatenate(heads, axis=-1)
    yn = ln(out1, g2, be2)
    h1 = yn @ w1 + bm1
    h1 = 0.5 * h1 * (1.0 + jax.scipy.special.erf(h1 / jnp.sqrt(2.0)))
    return out1 + h1 @ w2 + bm2


if __name__ == "__main__":
    B, N, D, H = 2, 8, 32, 2          # batch, tokens, hidden_d, n_heads
    mlp_ratio = 4
    dh = D // H

    key = jax.random.PRNGKey(0)
    ks = jax.random.split(key, 16)

    def rnd(k, shape, scale=0.05):
        return (scale * jax.random.normal(k, shape)).astype(jnp.float32)

    params = (
        1.0 + rnd(ks[0], (1, D)), rnd(ks[1], (1, D)),                      # LayerNorm1 gamma, beta
        rnd(ks[2], (H, dh, dh), 0.2), rnd(ks[3], (H, 1, dh)),              # per-head Q weight(in,out), bias
        rnd(ks[4], (H, dh, dh), 0.2), rnd(ks[5], (H, 1, dh)),              # per-head K
        rnd(ks[6], (H, dh, dh), 0.2), rnd(ks[7], (H, 1, dh)),              # per-head V
        1.0 + rnd(ks[8], (1, D)), rnd(ks[9], (1, D)),                      # LayerNorm2 gamma, beta
        rnd(ks[10], (D, mlp_ratio * D), 0.2), rnd(ks[11], (1, mlp_ratio * D)),  # MLP fc1 (in,out), bias
        rnd(ks[12], (mlp_ratio * D, D), 0.2), rnd(ks[13], (1, D)),              # MLP fc2 (in,out), bias
    )
    x = jax.random.normal(ks[14], (B, N, D), dtype=jnp.float32)

    packed = pack_vit_params(params, H)       # one-time host-side weight packing
    out = vit_block(x, packed, H)
    jax.block_until_ready(out)

    ref = _ref(x, params, H)
    np.testing.assert_allclose(np.asarray(out), np.asarray(ref), atol=2e-3, rtol=2e-3)
    print("KERNEL_OK")
</pallas_src>

<mosaic_0001>
module attributes {stable_mosaic.version = 11 : i64} {
  func.func @vit_block_kernel(%arg0: memref<16x32xf32, #tpu.memory_space<vmem>>, %arg1: memref<1x32xf32, #tpu.memory_space<vmem>>, %arg2: memref<1x32xf32, #tpu.memory_space<vmem>>, %arg3: memref<32x96xf32, #tpu.memory_space<vmem>>, %arg4: memref<1x96xf32, #tpu.memory_space<vmem>>, %arg5: memref<1x32xf32, #tpu.memory_space<vmem>>, %arg6: memref<1x32xf32, #tpu.memory_space<vmem>>, %arg7: memref<32x128xf32, #tpu.memory_space<vmem>>, %arg8: memref<1x128xf32, #tpu.memory_space<vmem>>, %arg9: memref<128x32xf32, #tpu.memory_space<vmem>>, %arg10: memref<1x32xf32, #tpu.memory_space<vmem>>, %arg11: memref<16x32xf32, #tpu.memory_space<vmem>>) attributes {dimension_semantics = [], scalar_prefetch = 0 : i64, scratch_operands = 0 : i64, tpu.core_type = #tpu.core_type<tc>} {
    %c0 = arith.constant 0 : index
    %c0_0 = arith.constant 0 : index
    %0 = vector.load %arg0[%c0, %c0_0] : memref<16x32xf32, #tpu.memory_space<vmem>>, vector<16x32xf32>
    %c0_1 = arith.constant 0 : index
    %c0_2 = arith.constant 0 : index
    %1 = vector.load %arg1[%c0_1, %c0_2] : memref<1x32xf32, #tpu.memory_space<vmem>>, vector<1x32xf32>
    %c0_3 = arith.constant 0 : index
    %c0_4 = arith.constant 0 : index
    %2 = vector.load %arg2[%c0_3, %c0_4] : memref<1x32xf32, #tpu.memory_space<vmem>>, vector<1x32xf32>
    %cst = arith.constant dense<0.000000e+00> : vector<16xf32>
    %3 = vector.multi_reduction <add>, %0, %cst [1] : vector<16x32xf32> to vector<16xf32>
    %4 = vector.shape_cast %3 : vector<16xf32> to vector<16x1xf32>
    %cst_5 = arith.constant 3.125000e-02 : f32
    %5 = vector.broadcast %cst_5 : f32 to vector<16x1xf32>
    %6 = arith.mulf %4, %5 : vector<16x1xf32>
    %7 = arith.mulf %0, %0 : vector<16x32xf32>
    %cst_6 = arith.constant dense<0.000000e+00> : vector<16xf32>
    %8 = vector.multi_reduction <add>, %7, %cst_6 [1] : vector<16x32xf32> to vector<16xf32>
    %9 = vector.shape_cast %8 : vector<16xf32> to vector<16x1xf32>
    %cst_7 = arith.constant 3.125000e-02 : f32
    %10 = vector.broadcast %cst_7 : f32 to vector<16x1xf32>
    %11 = arith.mulf %9, %10 : vector<16x1xf32>
    %12 = arith.mulf %6, %6 : vector<16x1xf32>
    %13 = arith.subf %11, %12 : vector<16x1xf32>
    %14 = vector.broadcast %6 : vector<16x1xf32> to vector<16x32xf32>
    %15 = arith.subf %0, %14 : vector<16x32xf32>
    %cst_8 = arith.constant 9.99999974E-6 : f32
    %16 = vector.broadcast %cst_8 : f32 to vector<16x1xf32>
    %17 = arith.addf %13, %16 : vector<16x1xf32>
    %18 = math.rsqrt %17 : vector<16x1xf32>
    %19 = vector.broadcast %18 : vector<16x1xf32> to vector<16x32xf32>
    %20 = arith.mulf %15, %19 : vector<16x32xf32>
    %21 = vector.broadcast %1 : vector<1x32xf32> to vector<16x32xf32>
    %22 = arith.mulf %20, %21 : vector<16x32xf32>
    %23 = vector.broadcast %2 : vector<1x32xf32> to vector<16x32xf32>
    %24 = arith.addf %22, %23 : vector<16x32xf32>
    %c0_9 = arith.constant 0 : index
    %c0_10 = arith.constant 0 : index
    %25 = vector.load %arg3[%c0_9, %c0_10] : memref<32x96xf32, #tpu.memory_space<vmem>>, vector<32x96xf32>
    %cst_11 = arith.constant dense<0.000000e+00> : vector<16x96xf32>
    %26 = tpu.matmul %24, %25, %cst_11 {dimension_numbers = #tpu.dot_dimension_numbers<[1], [0], [0], [1], [0, 0, 1, 1], [], []>} : vector<16x32xf32>, vector<32x96xf32>, vector<16x96xf32> -> vector<16x96xf32>
    %c0_12 = arith.constant 0 : index
    %c0_13 = arith.constant 0 : index
    %27 = vector.load %arg4[%c0_12, %c0_13] : memref<1x96xf32, #tpu.memory_space<vmem>>, vector<1x96xf32>
    %28 = vector.broadcast %27 : vector<1x96xf32> to vector<16x96xf32>
    %29 = arith.addf %26, %28 : vector<16x96xf32>
    %30 = vector.shape_cast %29 : vector<16x96xf32> to vector<2x8x96xf32>
    %31 = vector.extract_strided_slice %30 {offsets = [0, 0, 0], sizes = [2, 8, 16], strides = [1, 1, 1]} : vector<2x8x96xf32> to vector<2x8x16xf32>
    %32 = vector.extract_strided_slice %30 {offsets = [0, 0, 32], sizes = [2, 8, 16], strides = [1, 1, 1]} : vector<2x8x96xf32> to vector<2x8x16xf32>
    %33 = vector.extract_strided_slice %30 {offsets = [0, 0, 64], sizes = [2, 8, 16], strides = [1, 1, 1]} : vector<2x8x96xf32> to vector<2x8x16xf32>
    "tpu.trace_start"() <{level = 10 : i32, message = "bnd,bmd->bnm"}> : () -> ()
    %cst_14 = arith.constant dense<0.000000e+00> : vector<2x8x8xf32>
    %34 = tpu.matmul %31, %32, %cst_14 {dimension_numbers = #tpu.dot_dimension_numbers<[2], [2], [1], [1], [0, 0, 0, 1, 1, 1], [0], [0]>} : vector<2x8x16xf32>, vector<2x8x16xf32>, vector<2x8x8xf32> -> vector<2x8x8xf32>
    "tpu.trace_stop"() : () -> ()
    %cst_15 = arith.constant dense<0xFF800000> : vector<2x8xf32>
    %35 = vector.multi_reduction <maximumf>, %34, %cst_15 [2] : vector<2x8x8xf32> to vector<2x8xf32>
    %36 = vector.shape_cast %35 : vector<2x8xf32> to vector<2x8x1xf32>
    %37 = vector.broadcast %36 : vector<2x8x1xf32> to vector<2x8x8xf32>
    %38 = arith.subf %34, %37 : vector<2x8x8xf32>
    %39 = math.exp %38 : vector<2x8x8xf32>
    %cst_16 = arith.constant dense<0.000000e+00> : vector<2x8xf32>
    %40 = vector.multi_reduction <add>, %39, %cst_16 [2] : vector<2x8x8xf32> to vector<2x8xf32>
    %41 = vector.shape_cast %40 : vector<2x8xf32> to vector<2x8x1xf32>
    %42 = vector.broadcast %41 : vector<2x8x1xf32> to vector<2x8x8xf32>
    %43 = arith.divf %39, %42 : vector<2x8x8xf32>
    "tpu.trace_start"() <{level = 10 : i32, message = "bnm,bmd->bnd"}> : () -> ()
    %cst_17 = arith.constant dense<0.000000e+00> : vector<2x8x16xf32>
    %44 = tpu.matmul %43, %33, %cst_17 {dimension_numbers = #tpu.dot_dimension_numbers<[2], [1], [1], [2], [0, 0, 0, 1, 1, 2], [0], [0]>} : vector<2x8x8xf32>, vector<2x8x16xf32>, vector<2x8x16xf32> -> vector<2x8x16xf32>
    "tpu.trace_stop"() : () -> ()
    %45 = vector.extract_strided_slice %30 {offsets = [0, 0, 16], sizes = [2, 8, 16], strides = [1, 1, 1]} : vector<2x8x96xf32> to vector<2x8x16xf32>
    %46 = vector.extract_strided_slice %30 {offsets = [0, 0, 48], sizes = [2, 8, 16], strides = [1, 1, 1]} : vector<2x8x96xf32> to vector<2x8x16xf32>
    %47 = vector.extract_strided_slice %30 {offsets = [0, 0, 80], sizes = [2, 8, 16], strides = [1, 1, 1]} : vector<2x8x96xf32> to vector<2x8x16xf32>
    "tpu.trace_start"() <{level = 10 : i32, message = "bnd,bmd->bnm"}> : () -> ()
    %cst_18 = arith.constant dense<0.000000e+00> : vector<2x8x8xf32>
    %48 = tpu.matmul %45, %46, %cst_18 {dimension_numbers = #tpu.dot_dimension_numbers<[2], [2], [1], [1], [0, 0, 0, 1, 1, 1], [0], [0]>} : vector<2x8x16xf32>, vector<2x8x16xf32>, vector<2x8x8xf32> -> vector<2x8x8xf32>
    "tpu.trace_stop"() : () -> ()
    %cst_19 = arith.constant dense<0xFF800000> : vector<2x8xf32>
    %49 = vector.multi_reduction <maximumf>, %48, %cst_19 [2] : vector<2x8x8xf32> to vector<2x8xf32>
    %50 = vector.shape_cast %49 : vector<2x8xf32> to vector<2x8x1xf32>
    %51 = vector.broadcast %50 : vector<2x8x1xf32> to vector<2x8x8xf32>
    %52 = arith.subf %48, %51 : vector<2x8x8xf32>
    %53 = math.exp %52 : vector<2x8x8xf32>
    %cst_20 = arith.constant dense<0.000000e+00> : vector<2x8xf32>
    %54 = vector.multi_reduction <add>, %53, %cst_20 [2] : vector<2x8x8xf32> to vector<2x8xf32>
    %55 = vector.shape_cast %54 : vector<2x8xf32> to vector<2x8x1xf32>
    %56 = vector.broadcast %55 : vector<2x8x1xf32> to vector<2x8x8xf32>
    %57 = arith.divf %53, %56 : vector<2x8x8xf32>
    "tpu.trace_start"() <{level = 10 : i32, message = "bnm,bmd->bnd"}> : () -> ()
    %cst_21 = arith.constant dense<0.000000e+00> : vector<2x8x16xf32>
    %58 = tpu.matmul %57, %47, %cst_21 {dimension_numbers = #tpu.dot_dimension_numbers<[2], [1], [1], [2], [0, 0, 0, 1, 1, 2], [0], [0]>} : vector<2x8x8xf32>, vector<2x8x16xf32>, vector<2x8x16xf32> -> vector<2x8x16xf32>
    "tpu.trace_stop"() : () -> ()
    %59 = tpu.concatenate %44, %58 in 2 : vector<2x8x16xf32>, vector<2x8x16xf32> -> vector<2x8x32xf32>
    %60 = vector.shape_cast %59 : vector<2x8x32xf32> to vector<16x32xf32>
    %61 = arith.addf %0, %60 : vector<16x32xf32>
    %c0_22 = arith.constant 0 : index
    %c0_23 = arith.constant 0 : index
    %62 = vector.load %arg5[%c0_22, %c0_23] : memref<1x32xf32, #tpu.memory_space<vmem>>, vector<1x32xf32>
    %c0_24 = arith.constant 0 : index
    %c0_25 = arith.constant 0 : index
    %63 = vector.load %arg6[%c0_24, %c0_25] : memref<1x32xf32, #tpu.memory_space<vmem>>, vector<1x32xf32>
    %cst_26 = arith.constant dense<0.000000e+00> : vector<16xf32>
    %64 = vector.multi_reduction <add>, %61, %cst_26 [1] : vector<16x32xf32> to vector<16xf32>
    %65 = vector.shape_cast %64 : vector<16xf32> to vector<16x1xf32>
    %cst_27 = arith.constant 3.125000e-02 : f32
    %66 = vector.broadcast %cst_27 : f32 to vector<16x1xf32>
    %67 = arith.mulf %65, %66 : vector<16x1xf32>
    %68 = arith.mulf %61, %61 : vector<16x32xf32>
    %cst_28 = arith.constant dense<0.000000e+00> : vector<16xf32>
    %69 = vector.multi_reduction <add>, %68, %cst_28 [1] : vector<16x32xf32> to vector<16xf32>
    %70 = vector.shape_cast %69 : vector<16xf32> to vector<16x1xf32>
    %cst_29 = arith.constant 3.125000e-02 : f32
    %71 = vector.broadcast %cst_29 : f32 to vector<16x1xf32>
    %72 = arith.mulf %70, %71 : vector<16x1xf32>
    %73 = arith.mulf %67, %67 : vector<16x1xf32>
    %74 = arith.subf %72, %73 : vector<16x1xf32>
    %75 = vector.broadcast %67 : vector<16x1xf32> to vector<16x32xf32>
    %76 = arith.subf %61, %75 : vector<16x32xf32>
    %cst_30 = arith.constant 9.99999974E-6 : f32
    %77 = vector.broadcast %cst_30 : f32 to vector<16x1xf32>
    %78 = arith.addf %74, %77 : vector<16x1xf32>
    %79 = math.rsqrt %78 : vector<16x1xf32>
    %80 = vector.broadcast %79 : vector<16x1xf32> to vector<16x32xf32>
    %81 = arith.mulf %76, %80 : vector<16x32xf32>
    %82 = vector.broadcast %62 : vector<1x32xf32> to vector<16x32xf32>
    %83 = arith.mulf %81, %82 : vector<16x32xf32>
    %84 = vector.broadcast %63 : vector<1x32xf32> to vector<16x32xf32>
    %85 = arith.addf %83, %84 : vector<16x32xf32>
    %c0_31 = arith.constant 0 : index
    %c0_32 = arith.constant 0 : index
    %86 = vector.load %arg7[%c0_31, %c0_32] : memref<32x128xf32, #tpu.memory_space<vmem>>, vector<32x128xf32>
    %cst_33 = arith.constant dense<0.000000e+00> : vector<16x128xf32>
    %87 = tpu.matmul %85, %86, %cst_33 {dimension_numbers = #tpu.dot_dimension_numbers<[1], [0], [0], [1], [0, 0, 1, 1], [], []>} : vector<16x32xf32>, vector<32x128xf32>, vector<16x128xf32> -> vector<16x128xf32>
    %c0_34 = arith.constant 0 : index
    %c0_35 = arith.constant 0 : index
    %88 = vector.load %arg8[%c0_34, %c0_35] : memref<1x128xf32, #tpu.memory_space<vmem>>, vector<1x128xf32>
    %89 = vector.broadcast %88 : vector<1x128xf32> to vector<16x128xf32>
    %90 = arith.addf %87, %89 : vector<16x128xf32>
    %cst_36 = arith.constant 5.000000e-01 : f32
    %91 = vector.broadcast %cst_36 : f32 to vector<16x128xf32>
    %92 = arith.mulf %91, %90 : vector<16x128xf32>
    %cst_37 = arith.constant 0.707106769 : f32
    %93 = vector.broadcast %cst_37 : f32 to vector<16x128xf32>
    %94 = arith.mulf %90, %93 : vector<16x128xf32>
    %cst_38 = arith.constant 0.000000e+00 : f32
    %95 = vector.broadcast %cst_38 : f32 to vector<16x128xf32>
    %96 = arith.cmpf oge, %94, %95 : vector<16x128xf32>
    %cst_39 = arith.constant 1.000000e+00 : f32
    %cst_40 = arith.constant -1.000000e+00 : f32
    %97 = vector.broadcast %cst_39 : f32 to vector<16x128xf32>
    %98 = vector.broadcast %cst_40 : f32 to vector<16x128xf32>
    %99 = arith.select %96, %97, %98 : vector<16x128xi1>, vector<16x128xf32>
    %100 = math.absf %94 : vector<16x128xf32>
    %cst_41 = arith.constant 0.327591091 : f32
    %101 = vector.broadcast %cst_41 : f32 to vector<16x128xf32>
    %102 = arith.mulf %101, %100 : vector<16x128xf32>
    %cst_42 = arith.constant 1.000000e+00 : f32
    %103 = vector.broadcast %cst_42 : f32 to vector<16x128xf32>
    %104 = arith.addf %103, %102 : vector<16x128xf32>
    %cst_43 = arith.constant 1.000000e+00 : f32
    %105 = vector.broadcast %cst_43 : f32 to vector<16x128xf32>
    %106 = arith.divf %105, %104 : vector<16x128xf32>
    %cst_44 = arith.constant 1.06140542 : f32
    %107 = vector.broadcast %cst_44 : f32 to vector<16x128xf32>
    %108 = arith.mulf %107, %106 : vector<16x128xf32>
    %cst_45 = arith.constant -1.45315206 : f32
    %109 = vector.broadcast %cst_45 : f32 to vector<16x128xf32>
    %110 = arith.addf %108, %109 : vector<16x128xf32>
    %111 = arith.mulf %110, %106 : vector<16x128xf32>
    %cst_46 = arith.constant 1.42141378 : f32
    %112 = vector.broadcast %cst_46 : f32 to vector<16x128xf32>
    %113 = arith.addf %111, %112 : vector<16x128xf32>
    %114 = arith.mulf %113, %106 : vector<16x128xf32>
    %cst_47 = arith.constant -0.284496725 : f32
    %115 = vector.broadcast %cst_47 : f32 to vector<16x128xf32>
    %116 = arith.addf %114, %115 : vector<16x128xf32>
    %117 = arith.mulf %116, %106 : vector<16x128xf32>
    %cst_48 = arith.constant 0.254829586 : f32
    %118 = vector.broadcast %cst_48 : f32 to vector<16x128xf32>
    %119 = arith.addf %117, %118 : vector<16x128xf32>
    %120 = arith.mulf %119, %106 : vector<16x128xf32>
    %cst_49 = arith.constant 0.000000e+00 : f32
    %121 = vector.broadcast %cst_49 : f32 to vector<16x128xf32>
    %122 = arith.subf %121, %100 : vector<16x128xf32>
    %123 = arith.mulf %122, %100 : vector<16x128xf32>
    %124 = math.exp %123 : vector<16x128xf32>
    %125 = arith.mulf %120, %124 : vector<16x128xf32>
    %cst_50 = arith.constant 1.000000e+00 : f32
    %126 = vector.broadcast %cst_50 : f32 to vector<16x128xf32>
    %127 = arith.subf %126, %125 : vector<16x128xf32>
    %128 = arith.mulf %99, %127 : vector<16x128xf32>
    %cst_51 = arith.constant 1.000000e+00 : f32
    %129 = vector.broadcast %cst_51 : f32 to vector<16x128xf32>
    %130 = arith.addf %129, %128 : vector<16x128xf32>
    %131 = arith.mulf %92, %130 : vector<16x128xf32>
    %c0_52 = arith.constant 0 : index
    %c0_53 = arith.constant 0 : index
    %132 = vector.load %arg9[%c0_52, %c0_53] : memref<128x32xf32, #tpu.memory_space<vmem>>, vector<128x32xf32>
    %cst_54 = arith.constant dense<0.000000e+00> : vector<16x32xf32>
    %133 = tpu.matmul %131, %132, %cst_54 {dimension_numbers = #tpu.dot_dimension_numbers<[1], [0], [0], [1], [0, 0, 1, 1], [], []>} : vector<16x128xf32>, vector<128x32xf32>, vector<16x32xf32> -> vector<16x32xf32>
    %c0_55 = arith.constant 0 : index
    %c0_56 = arith.constant 0 : index
    %134 = vector.load %arg10[%c0_55, %c0_56] : memref<1x32xf32, #tpu.memory_space<vmem>>, vector<1x32xf32>
    %135 = vector.broadcast %134 : vector<1x32xf32> to vector<16x32xf32>
    %136 = arith.addf %133, %135 : vector<16x32xf32>
    %137 = arith.addf %61, %136 : vector<16x32xf32>
    %c0_57 = arith.constant 0 : index
    %c0_58 = arith.constant 0 : index
    %138 = vector.load %arg11[%c0_57, %c0_58] : memref<16x32xf32, #tpu.memory_space<vmem>>, vector<16x32xf32>
    tpu.vector_store %arg11[%c0_57, %c0_58], %137 {strides = array<i32>} : memref<16x32xf32, #tpu.memory_space<vmem>>, vector<16x32xf32>,
    return
  }
}

</mosaic_0001>

<bundles_post_ra>
// kernel: tpu_custom_call.1
= control target key start
LH: loop header
LB: loop body
LE: loop exit
PB: predicated region body
PF: predicated region fallthrough
CT: control target
= control target key end

     0   :  { %vm43_vm0 = vcmask 261120   ;;  %s1735_s0 = inlined_call_operand.vmem [shape: f32[16,32], index: 0, kind: input, shape index: {}]   ;;  %s1736_s1 = inlined_call_operand.vmem [shape: f32[1,32], index: 1, kind: input, shape index: {}]   ;;  %s1737_s2 = inlined_call_operand.vmem [shape: f32[1,32], index: 2, kind: input, shape index: {}]   ;;  %s1738_s3 = inlined_call_operand.vmem [shape: f32[32,96], index: 3, kind: input, shape index: {}]   ;;  %s1739_s4 = inlined_call_operand.vmem [shape: f32[1,96], index: 4, kind: input, shape index: {}]   ;;  %s1740_s5 = inlined_call_operand.vmem [shape: f32[1,32], index: 5, kind: input, shape index: {}]   ;;  %s1741_s6 = inlined_call_operand.vmem [shape: f32[1,32], index: 6, kind: input, shape index: {}]   ;;  %s1742_s7 = inlined_call_operand.vmem [shape: f32[32,128], index: 7, kind: input, shape index: {}]   ;;  %s1743_s8 = inlined_call_operand.vmem [shape: f32[1,128], index: 8, kind: input, shape index: {}]   ;;  %s1744_s9 = inlined_call_operand.vmem [shape: f32[128,32], index: 9, kind: input, shape index: {}]   ;;  %s1745_s10 = inlined_call_operand.vmem [shape: f32[1,32], index: 10, kind: input, shape index: {}]   ;;  %s1746_s11 = inlined_call_operand.hbm [shape: f32[16,32], index: 11, kind: output, shape index: {}]  }
   0x1   :  { %v1523_v0 = vld [vmem:[%s1735_s0] sm:$0xff]  ;;  %v1528_v1 = vld [vmem:[%s1735_s0 + $0x8] sm:$0xff] }
   0x2   :  { %16 = vsyncpa [#allocation3], 0  ;;  %v44_v2 = vsel %vm43_vm0, %v1523_v0, 0.0  ;;  %v52_v3 = vmul.f32 %v1523_v0, %v1523_v0  ;;  %v53_v4 = vmul.f32 %v1528_v1, %v1528_v1  ;;  %v47_v6 = vsel %vm43_vm0, %v1528_v1, 0.0  ;;  %v90_v8 = vld [vmem:[%s1738_s3] sm:$0xff]  ;;  %v91_v9 = vld [vmem:[%s1738_s3 + $0x8] sm:$0xff] }
   0x3   :  { %45 = vadd.xlane.f32.xlu0 %v44_v2  ;;  %v92_v10 = vld [vmem:[%s1738_s3 + $0x10] sm:$0xff]  ;;  %v1332_v11 = vpack.c.bf16 %v91_v9, %v90_v8  ;;  %v93_v12 = vld [vmem:[%s1738_s3 + $0x18] sm:$0xff]  ;;  %v1166_v30 = vld [vmem:[%s1736_s1] ss:$0 sm:$0xff]  ;;  %v1448_v40 = vmov 0.0   ;;  %vm1449_vm1 = vmmov 0  }
   0x4   :  { %v54_v5 = vsel %vm43_vm0, %v52_v3, 0.0  ;;  %v57_v7 = vsel %vm43_vm0, %v53_v4, 0.0  ;;  %v1336_v13 = vpack.c.bf16 %v93_v12, %v92_v10  ;;  %v1167_v32 = vld [vmem:[%s1737_s2] ss:$0 sm:$0xff]  ;;  %1271 = vmatprep.subr.mxu1 %v1448_v40  ;;  %1273 = vmatprep.mubr.msk.f32.mxu1 %vm1449_vm1, %v1448_v40  ;;  %s1450_s12 = smov 96   ;;  %vm185_vm2 = vcmask 130048  }
   0x5   :  { %55 = vadd.xlane.f32.xlu1 %v54_v5  ;;  %1333 = vmatprep.subr.bf16.mxu0 %v1332_v11  ;;  %v1168_v41 = vld [vmem:[%s1739_s4] ss:$0 sm:$0xff]  ;;  %vm337_vm3 = vcmask 64512   ;;  %s1451_s4 = smov 64   ;;  %s1452_s13 = smov 80  }
   0x6   :  { %1335 = vmatpush3.bf16.msra.mxu0 %v1332_v11  ;;  %s1453_s14 = smov 112   ;;  %s1454_s15 = smov 48  }
   0x7   :  { %48 = vadd.xlane.f32.xlu0 %v47_v6  ;;  %1337 = vmatprep.subr.bf16.mxu0 %v1336_v13  ;;  %s1455_s16 = smov 16   ;;  %s1457_s1 = smov [#allocation2]  }
   0x8   :  { %s1155_s2 = sshll.u32 %s1457_s1, 4  ;;  %s1156_s2 = int_to_ptr.vmem [resolvable:$true] %s1155_s2 }
   0x9   :  { %58 = vadd.xlane.f32.xlu1 %v57_v7  ;;  %p1429_p1 = scmp.lt.s32.totalorder %s1156_s2, %s1156_s2 }
   0xa   :  { %1339 = vmatpush3.bf16.msra.mxu0 %v1336_v13 }
   0xb   :  { %1246 = vmatprep.subr.mxu0 %v1448_v40 }
  0x90   :  { %v46_v14 = vpop.xlane.xlu0 %45 }
  0x91   :  { %v50_v15 = vmul.f32 0.03125, %v46_v14 }
  0x92   :  { %v56_v16 = vpop.xlane.xlu1 %55 }
  0x93   :  { %v62_v17 = vmul.f32 %v50_v15, %v50_v15  ;;  %v60_v18 = vmul.f32 0.03125, %v56_v16  ;;  %v66_v28 = vsub.f32 %v1523_v0, %v50_v15 }
  0x94   :  { %v49_v19 = vpop.xlane.xlu0 %48 }
  0x95   :  { %v64_v20 = vsub.f32 %v60_v18, %v62_v17  ;;  %v51_v21 = vmul.f32 0.03125, %v49_v19 }
  0x96   :  { %v59_v22 = vpop.xlane.xlu1 %58 }
  0x97   :  { %v68_v23 = vadd.f32 1e-05, %v64_v20  ;;  %v63_v24 = vmul.f32 %v51_v21, %v51_v21  ;;  %v61_v25 = vmul.f32 0.03125, %v59_v22  ;;  %v67_v33 = vsub.f32 %v1528_v1, %v51_v21 }
  0x99   :  { %1392 = vrsqrt.f32 %v68_v23  ;;  %v65_v26 = vsub.f32 %v61_v25, %v63_v24 }
  0x9b   :  { %v69_v27 = vadd.f32 1e-05, %v65_v26 }
  0x9d   :  { %1394 = vrsqrt.f32 %v69_v27 }
  0xa3   :  { %v1393_v29 = vpop.eup %1392 }
  0xa4   :  { %v72_v31 = vmul.f32 %v1393_v29, %v66_v28 }
  0xa6   :  { %v80_v34 = vmul.f32 %v1166_v30, %v72_v31 }
  0xa7   :  { %v1395_v35 = vpop.eup %1394 }
  0xa8   :  { %v73_v36 = vmul.f32 %v1395_v35, %v67_v33  ;;  %v88_v37 = vadd.f32 %v1167_v32, %v80_v34 }
  0xaa   :  { %v81_v38 = vmul.f32 %v1166_v30, %v73_v36  ;;  %1243 = vmatprep.mubr.msk.f32.mxu0 %vm43_vm0, %v88_v37 }
  0xac   :  { %v89_v39 = vadd.f32 %v1167_v32, %v81_v38 }
  0xae   :  { %1244 = vmatmul.mubr.msk.f32.vlgmr.msra.gmra.mrb[0].mxu0 %vm43_vm0, %v89_v39 }
  0xaf   :  { %1248 = vmatprep.mubr.msk.f32.mxu0 %vm1449_vm1, %v1448_v40 }
 0x181   :  { %v1245_v42 = vpop.f32.mrb[0].mxu0 }
 0x182   :  { %v1571_v43 = vadd.f32 %v1245_v42, %v1168_v41  ;;  %v173_v44 = vpop.f32.mrb[1].mxu0 }
 0x183   :  { %v1573_v45 = vadd.f32 %v1168_v41, %v173_v44 }
 0x184   :  { %261 = vrot.lane.b32.xlu1 %v1571_v43, %s1450_s12 }
 0x185   :  { %183 = vrot.lane.b32.xlu0 %v1573_v45, %s1450_s12  ;;  %s1424_s12 = scalar_lea.vmem %s1156_s2, 256 }
 0x186   :  { %p1425_p0 = scmp.ne.s32.totalorder %s1156_s2, %s1424_s12  ;;  %p1430_p2 = scmp.lt.s32.totalorder %s1424_s12, %s1424_s12 }
 0x188   :  { %p1431_p3 = por %p1430_p2, %p1429_p1 }
 0x18a   :  { %p1432_p4 = pnand %p1431_p3, %p1425_p0 }
 0x1f6   :  { %v262_v47 = vpop.permute.xlu1 %261 }
 0x1f7   :  { %v184_v46 = vpop.permute.xlu0 %183 }
 0x1f8   :  { %1247 = vmatpush3.xpose.msk.msra.mxu0 %vm185_vm2, %v184_v46 }
 0x1f9   :  { %1251 = vmatprep.subr.mxu0 %v1448_v40 }
 0x1fb   :  { %1249 = vmatmul.mubr.msk.f32.vlgmr.msra.gmra.mrb[2].mxu0 %vm185_vm2, %v1573_v45 }
 0x1fc   :  { %1252 = vmatpush3.xpose.msk.msra.mxu0 %vm185_vm2, %v262_v47  ;;  %1253 = vmatprep.mubr.msk.f32.mxu0 %vm1449_vm1, %v1448_v40 }
 0x1fd   :  { %1256 = vmatprep.subr.mxu0 %v1448_v40 }
 0x1ff   :  { %1254 = vmatmul.mubr.msk.f32.vlgmr.msra.gmra.mrb[4].mxu0 %vm185_vm2, %v1571_v43 }
 0x200   :  { %1258 = vmatprep.mubr.msk.f32.mxu0 %vm1449_vm1, %v1448_v40 }
 0x2ce   :  { %v256_v48 = vpop.f32.mrb[2].mxu0 }
 0x2cf   :  { %v1250_v49 = vpop.f32.mrb[3].mxu0  ;;  %v338_v50 = vsel %vm337_vm3, %v256_v48, -inf }
 0x2d0   :  { %339 = vmax.xlane.f32.xlu1 %v338_v50 }
 0x2d2   :  { %v333_v51 = vpop.f32.mrb[4].mxu0 }
 0x2d3   :  { %v1255_v52 = vpop.f32.mrb[5].mxu0  ;;  %v341_v53 = vsel %vm337_vm3, %v333_v51, -inf }
 0x2d4   :  { %342 = vmax.xlane.f32.xlu0 %v341_v53 }
 0x2e1   :  { %436 = vrot.lane.b32.xlu1 %v1571_v43, %s1451_s4 }
 0x2e5   :  { %514 = vrot.lane.b32.xlu1 %v1573_v45, %s1452_s13 }
 0x2e9   :  { %592 = vrot.lane.b32.xlu1 %v1571_v43, %s1452_s13 }
 0x35d   :  { %v340_v54 = vpop.xlane.xlu1 %339 }
 0x35e   :  { %v344_v55 = vsub.f32 %v256_v48, %v340_v54 }
 0x360   :  { %v346_v56 = vmul.f32 1.442695, %v344_v55 }
 0x361   :  { %v437_v57 = vpop.permute.xlu1 %436  ;;  %v343_v58 = vpop.xlane.xlu0 %342 }
 0x362   :  { %1396 = vpow2.f32 %v346_v56  ;;  %v345_v59 = vsub.f32 %v333_v51, %v343_v58  ;;  %v904_v58 = vld [vmem:[%s1742_s7 + $0x10] sm:$0xff] }
 0x364   :  { %v348_v60 = vmul.f32 1.442695, %v345_v59 }
 0x365   :  { %v515_v61 = vpop.permute.xlu1 %514 }
 0x366   :  { %1398 = vpow2.f32 %v348_v60  ;;  %v905_v60 = vld [vmem:[%s1742_s7 + $0x18] sm:$0xff] }
 0x369   :  { %v593_v62 = vpop.permute.xlu1 %592 }
 0x36a   :  { %1272 = vmatpush3.xpose.msk.msra.mxu1 %vm185_vm2, %v593_v62 }
 0x36b   :  { %1281 = vmatprep.subr.mxu1 %v1448_v40 }
 0x36c   :  { %v1397_v63 = vpop.eup %1396 }
 0x36d   :  { %v350_v2 = vsel %vm337_vm3, %v1397_v63, 0.0 }
 0x36e   :  { %351 = vadd.xlane.f32.xlu0 %v350_v2 }
 0x370   :  { %v1399_v3 = vpop.eup %1398 }
 0x371   :  { %v353_v4 = vsel %vm337_vm3, %v1399_v3, 0.0 }
 0x372   :  { %354 = vadd.xlane.f32.xlu1 %v353_v4 }
 0x383   :  { %590 = vrot.lane.b32.xlu1 %v1571_v43, %s1453_s14 }
 0x384   :  { %360 = vrot.lane.b32.xlu0 %v1573_v45, %s1451_s4 }
 0x388   :  { %512 = vrot.lane.b32.xlu0 %v1573_v45, %s1453_s14 }
 0x3fb   :  { %v352_v5 = vpop.xlane.xlu0 %351 }
 0x3fc   :  { %1400 = vrcp.f32 %v352_v5 }
 0x3ff   :  { %v355_v6 = vpop.xlane.xlu1 %354  ;;  %v361_v7 = vpop.permute.xlu0 %360 }
 0x400   :  { %1402 = vrcp.f32 %v355_v6  ;;  %1257 = vmatpush3.msra.mxu0 %v361_v7 }
 0x401   :  { %1261 = vmatprep.subr.mxu0 %v1448_v40 }
 0x403   :  { %v591_v8 = vpop.permute.xlu1 %590  ;;  %v513_v13 = vpop.permute.xlu0 %512 }
 0x404   :  { %1274 = vmatmul.mubr.msk.f32.vlgmr.msra.gmra.mrb[0].mxu1 %vm185_vm2, %v591_v8 }
 0x405   :  { %1283 = vmatprep.mubr.msk.f32.mxu1 %vm1449_vm1, %v1448_v40 }
 0x406   :  { %v1401_v9 = vpop.eup %1400 }
 0x407   :  { %v357_v10 = vmul.f32 %v1401_v9, %v1397_v63 }
 0x409   :  { %1259 = vmatmul.mubr.msk.f32.vlgmr.msra.gmra.mrb[6].mxu0 %vm337_vm3, %v357_v10 }
 0x40a   :  { %v1403_v11 = vpop.eup %1402  ;;  %1262 = vmatpush3.msra.mxu0 %v437_v57  ;;  %1263 = vmatprep.mubr.msk.f32.mxu0 %vm1449_vm1, %v1448_v40  ;;  %v902_v57 = vld [vmem:[%s1742_s7] sm:$0xff] }
 0x40b   :  { %v359_v12 = vmul.f32 %v1403_v11, %v1399_v3  ;;  %1266 = vmatprep.subr.mxu0 %v1448_v40 }
 0x40d   :  { %1264 = vmatmul.mubr.msk.f32.vlgmr.msra.gmra.mrb[8].mxu0 %vm337_vm3, %v359_v12 }
 0x40e   :  { %1268 = vmatprep.mubr.msk.f32.mxu0 %vm1449_vm1, %v1448_v40 }
 0x411   :  { %1267 = vmatpush3.xpose.msk.msra.mxu0 %vm185_vm2, %v515_v61  ;;  %v1344_v61 = vpack.c.bf16 %v905_v60, %v904_v58 }
 0x412   :  { %1276 = vmatprep.subr.mxu0 %v1448_v40 }
 0x414   :  { %1269 = vmatmul.mubr.msk.f32.vlgmr.msra.gmra.mrb[10].mxu0 %vm185_vm2, %v513_v13 }
 0x415   :  { %1278 = vmatprep.mubr.msk.f32.mxu0 %vm1449_vm1, %v1448_v40 }
 0x4d7   :  { %v664_v14 = vpop.f32.mrb[0].mxu1 }
 0x4d8   :  { %v1275_v15 = vpop.f32.mrb[1].mxu1  ;;  %v671_v16 = vsel %vm337_vm3, %v664_v14, -inf }
 0x4d9   :  { %672 = vmax.xlane.f32.xlu1 %v671_v16  ;;  %v1183_v16 = vld [vmem:[%s1740_s5] ss:$0 sm:$0xff] }
 0x4dc   :  { %v432_v17 = vpop.f32.mrb[6].mxu0 }
 0x4dd   :  { %v1260_v18 = vpop.f32.mrb[7].mxu0 }
 0x4de   :  { %v1184_v18 = vld [vmem:[%s1741_s6] ss:$0 sm:$0xff] }
 0x4e0   :  { %v508_v19 = vpop.f32.mrb[8].mxu0 }
 0x4e1   :  { %v1265_v20 = vpop.f32.mrb[9].mxu0 }
 0x4e7   :  { %v586_v21 = vpop.f32.mrb[10].mxu0 }
 0x4e8   :  { %v1270_v22 = vpop.f32.mrb[11].mxu0  ;;  %v668_v23 = vsel %vm337_vm3, %v586_v21, -inf }
 0x4e9   :  { %669 = vmax.xlane.f32.xlu0 %v668_v23 }
 0x4ea   :  { %766 = vrot.lane.b32.xlu1 %v1571_v43, %s1454_s15 }
 0x566   :  { %v673_v24 = vpop.xlane.xlu1 %672 }
 0x567   :  { %v675_v25 = vsub.f32 %v664_v14, %v673_v24 }
 0x569   :  { %v678_v26 = vmul.f32 1.442695, %v675_v25 }
 0x56a   :  { %v767_v27 = vpop.permute.xlu1 %766 }
 0x56b   :  { %1404 = vpow2.f32 %v678_v26  ;;  %1282 = vmatpush3.msra.mxu1 %v767_v27  ;;  %v1048_v26 = vld [vmem:[%s1744_s9] sm:$0xff]  ;;  %v1049_v27 = vld [vmem:[%s1744_s9 + $0x8] sm:$0xff] }
 0x575   :  { %v1405_v28 = vpop.eup %1404 }
 0x576   :  { %v670_v29 = vpop.xlane.xlu0 %669  ;;  %v683_v30 = vsel %vm337_vm3, %v1405_v28, 0.0 }
 0x577   :  { %v674_v31 = vsub.f32 %v586_v21, %v670_v29  ;;  %684 = vadd.xlane.f32.xlu0 %v683_v30  ;;  %v1050_v29 = vld [vmem:[%s1744_s9 + $0x10] sm:$0xff]  ;;  %v1051_v30 = vld [vmem:[%s1744_s9 + $0x18] sm:$0xff] }
 0x579   :  { %v676_v32 = vmul.f32 1.442695, %v674_v31  ;;  %v1352_v31 = vpack.c.bf16 %v1051_v30, %v1050_v29 }
 0x57b   :  { %1406 = vpow2.f32 %v676_v32  ;;  %v1052_v32 = vld [vmem:[%s1744_s9 + $0x20] sm:$0xff] }
 0x585   :  { %v1407_v33 = vpop.eup %1406 }
 0x586   :  { %v680_v34 = vsel %vm337_vm3, %v1407_v33, 0.0 }
 0x587   :  { %681 = vadd.xlane.f32.xlu0 %v680_v34 }
 0x59d   :  { %690 = vrot.lane.b32.xlu0 %v1573_v45, %s1454_s15 }
 0x604   :  { %v685_v35 = vpop.xlane.xlu0 %684 }
 0x605   :  { %1408 = vrcp.f32 %v685_v35  ;;  %v1054_v35 = vld [vmem:[%s1744_s9 + $0x30] sm:$0xff] }
 0x60f   :  { %v1409_v36 = vpop.eup %1408 }
 0x610   :  { %v689_v37 = vmul.f32 %v1409_v36, %v1405_v28  ;;  %v1348_v28 = vpack.c.bf16 %v1049_v27, %v1048_v26  ;;  %v1055_v36 = vld [vmem:[%s1744_s9 + $0x38] sm:$0xff] }
 0x612   :  { %1284 = vmatmul.mubr.msk.f32.vlgmr.msra.gmra.mrb[2].mxu1 %vm337_vm3, %v689_v37  ;;  %1349 = vmatprep.subr.bf16.mxu1 %v1348_v28  ;;  %v1360_v37 = vpack.c.bf16 %v1055_v36, %v1054_v35 }
 0x613   :  { %1351 = vmatpush3.bf16.msra.mxu1 %v1348_v28 }
 0x614   :  { %v682_v38 = vpop.xlane.xlu0 %681  ;;  %1353 = vmatprep.subr.bf16.mxu1 %v1352_v31 }
 0x615   :  { %1410 = vrcp.f32 %v682_v38  ;;  %v1056_v38 = vld [vmem:[%s1744_s9 + $0x40] sm:$0xff] }
 0x617   :  { %1355 = vmatpush3.bf16.msra.mxu1 %v1352_v31 }
 0x618   :  { %v691_v39 = vpop.permute.xlu0 %690 }
 0x619   :  { %1277 = vmatpush3.msra.mxu0 %v691_v39  ;;  %v1057_v39 = vld [vmem:[%s1744_s9 + $0x48] sm:$0xff] }
 0x61f   :  { %v1411_v40 = vpop.eup %1410 }
 0x620   :  { %v687_v41 = vmul.f32 %v1411_v40, %v1407_v33  ;;  %v1053_v33 = vld [vmem:[%s1744_s9 + $0x28] sm:$0xff]  ;;  %v1364_v40 = vpack.c.bf16 %v1057_v39, %v1056_v38 }
 0x621   :  { %v1356_v34 = vpack.c.bf16 %v1053_v33, %v1052_v32  ;;  %v1456_v32 = vmov -1.0  }
 0x622   :  { %1279 = vmatmul.mubr.msk.f32.vlgmr.msra.gmra.mrb[12].mxu0 %vm337_vm3, %v687_v41  ;;  %v1058_v41 = vld [vmem:[%s1744_s9 + $0x50] sm:$0xff] }
 0x623   :  { %1357 = vmatprep.subr.bf16.mxu1 %v1356_v34 }
 0x624   :  { %1359 = vmatpush3.bf16.msra.mxu1 %v1356_v34 }
 0x625   :  { %1361 = vmatprep.subr.bf16.mxu1 %v1360_v37 }
 0x628   :  { %1363 = vmatpush3.bf16.msra.mxu1 %v1360_v37 }
 0x629   :  { %1365 = vmatprep.subr.bf16.mxu1 %v1364_v40 }
 0x62c   :  { %1367 = vmatpush3.bf16.msra.mxu1 %v1364_v40 }
 0x6e5   :  { %v838_v42 = vpop.f32.mrb[2].mxu1 }
 0x6e6   :  { %v1285_v43 = vpop.f32.mrb[3].mxu1 }
 0x6f5   :  { %v762_v44 = vpop.f32.mrb[12].mxu0 }
 0x6f6   :  { %844 = vrot.lane.b32.xlu1 %v762_v44, %s1455_s16  ;;  %v1280_v45 = vpop.f32.mrb[13].mxu0  ;;  %v1060_v44 = vld [vmem:[%s1744_s9 + $0x60] sm:$0xff] }
 0x6f7   :  { %v1061_v45 = vld [vmem:[%s1744_s9 + $0x68] sm:$0xff] }
 0x6fa   :  { %846 = vrot.lane.b32.xlu1 %v838_v42, %s1455_s16  ;;  %v1059_v42 = vld [vmem:[%s1744_s9 + $0x58] sm:$0xff] }
 0x6fb   :  { %v1368_v43 = vpack.c.bf16 %v1059_v42, %v1058_v41 }
 0x6fd   :  { %1369 = vmatprep.subr.bf16.mxu1 %v1368_v43 }
 0x6fe   :  { %1371 = vmatpush3.bf16.msra.mxu1 %v1368_v43 }
 0x768   :  { %v845_v46 = vpop.permute.xlu1 %844 }
 0x769   :  { %v850_v47 = vsel %vm185_vm2, %v432_v17, %v845_v46  ;;  %v1372_v46 = vpack.c.bf16 %v1061_v45, %v1060_v44  ;;  %v1188_v44 = vld [vmem:[%s1745_s10] ss:$0 sm:$0xff] }
 0x76a   :  { %v1627_v48 = vadd.f32 %v850_v47, %v1523_v0  ;;  %v1062_v47 = vld [vmem:[%s1744_s9 + $0x70] sm:$0xff] }
 0x76b   :  { %1373 = vmatprep.subr.bf16.mxu1 %v1372_v46 }
 0x76c   :  { %v847_v49 = vpop.permute.xlu1 %846  ;;  %v856_v50 = vsel %vm43_vm0, %v1627_v48, 0.0  ;;  %v864_v51 = vmul.f32 %v1627_v48, %v1627_v48  ;;  %1375 = vmatpush3.bf16.msra.mxu1 %v1372_v46 }
 0x76d   :  { %v851_v52 = vsel %vm185_vm2, %v508_v19, %v847_v49  ;;  %857 = vadd.xlane.f32.xlu0 %v856_v50  ;;  %v1063_v49 = vld [vmem:[%s1744_s9 + $0x78] sm:$0xff] }
 0x76e   :  { %v1635_v53 = vadd.f32 %v851_v52, %v1528_v1  ;;  %v866_v54 = vsel %vm43_vm0, %v864_v51, 0.0  ;;  %v903_v1 = vld [vmem:[%s1742_s7 + $0x8] sm:$0xff]  ;;  %v1376_v50 = vpack.c.bf16 %v1063_v49, %v1062_v47  ;;  %v1185_v51 = vld [vmem:[%s1743_s8] ss:$0 sm:$0xff] }
 0x76f   :  { %v1340_v59 = vpack.c.bf16 %v903_v1, %v902_v57 }
 0x770   :  { %v859_v55 = vsel %vm43_vm0, %v1635_v53, 0.0  ;;  %v865_v0 = vmul.f32 %v1635_v53, %v1635_v53  ;;  %1377 = vmatprep.subr.bf16.mxu1 %v1376_v50 }
 0x771   :  { %867 = vadd.xlane.f32.xlu0 %v866_v54  ;;  %860 = vadd.xlane.f32.xlu1 %v859_v55 }
 0x772   :  { %v869_v56 = vsel %vm43_vm0, %v865_v0, 0.0  ;;  %1341 = vmatprep.subr.bf16.mxu0 %v1340_v59  ;;  %1379 = vmatpush3.bf16.msra.mxu1 %v1376_v50 }
 0x773   :  { %1343 = vmatpush3.bf16.msra.mxu0 %v1340_v59 }
 0x774   :  { %1345 = vmatprep.subr.bf16.mxu0 %v1344_v61 }
 0x775   :  { %870 = vadd.xlane.f32.xlu0 %v869_v56 }
 0x777   :  { %1347 = vmatpush3.bf16.msra.mxu0 %v1344_v61 }
 0x7fa   :  { %v858_v62 = vpop.xlane.xlu0 %857 }
 0x7fb   :  { %v862_v63 = vmul.f32 0.03125, %v858_v62 }
 0x7fd   :  { %v874_v4 = vmul.f32 %v862_v63, %v862_v63  ;;  %v878_v14 = vsub.f32 %v1627_v48, %v862_v63 }
 0x7fe   :  { %v868_v2 = vpop.xlane.xlu0 %867  ;;  %v861_v3 = vpop.xlane.xlu1 %860 }
 0x7ff   :  { %v872_v5 = vmul.f32 0.03125, %v868_v2  ;;  %v863_v6 = vmul.f32 0.03125, %v861_v3 }
 0x801   :  { %v876_v7 = vsub.f32 %v872_v5, %v874_v4  ;;  %v875_v10 = vmul.f32 %v863_v6, %v863_v6  ;;  %v879_v19 = vsub.f32 %v1635_v53, %v863_v6 }
 0x802   :  { %v871_v8 = vpop.xlane.xlu0 %870 }
 0x803   :  { %v880_v9 = vadd.f32 1e-05, %v876_v7  ;;  %v873_v11 = vmul.f32 0.03125, %v871_v8 }
 0x805   :  { %1412 = vrsqrt.f32 %v880_v9  ;;  %v877_v12 = vsub.f32 %v873_v11, %v875_v10 }
 0x807   :  { %v881_v13 = vadd.f32 1e-05, %v877_v12 }
 0x809   :  { %1414 = vrsqrt.f32 %v881_v13 }
 0x80f   :  { %v1413_v15 = vpop.eup %1412 }
 0x810   :  { %v884_v17 = vmul.f32 %v1413_v15, %v878_v14 }
 0x812   :  { %v892_v20 = vmul.f32 %v1183_v16, %v884_v17 }
 0x813   :  { %v1415_v21 = vpop.eup %1414 }
 0x814   :  { %v885_v22 = vmul.f32 %v1415_v21, %v879_v19  ;;  %v900_v23 = vadd.f32 %v1184_v18, %v892_v20 }
 0x816   :  { %v893_v24 = vmul.f32 %v1183_v16, %v885_v22  ;;  %1294 = vmatprep.mubr.msk.f32.mxu0 %vm43_vm0, %v900_v23 }
 0x818   :  { %v901_v25 = vadd.f32 %v1184_v18, %v893_v24 }
 0x81a   :  { %1295 = vmatmul.mubr.msk.f32.vlgmr.msra.gmra.mrb[14].mxu0 %vm43_vm0, %v901_v25 }
 0x8ed   :  { %v1296_v52 = vpop.f32.mrb[14].mxu0 }
 0x8ee   :  { %v991_v54 = vadd.f32 %v1296_v52, %v1185_v51  ;;  %v985_v55 = vpop.f32.mrb[15].mxu0 }
 0x8ef   :  { %v986_v0 = vadd.f32 %v1185_v51, %v985_v55 }
 0x8f0   :  { %v997_v56 = vmul.f32 0.70710677, %v991_v54  ;;  %v995_v41 = vmul.f32 0.5, %v991_v54 }
 0x8f1   :  { %v996_v57 = vmul.f32 0.70710677, %v986_v0  ;;  %v994_v39 = vmul.f32 0.5, %v986_v0 }
 0x8f2   :  { %v1003_v1 = vand.u32 2147483647, %v997_v56  ;;  %vm999_vm4 = vcmp.ge.f32.partialorder %v997_v56, 0.0 }
 0x8f3   :  { %v1002_v58 = vand.u32 2147483647, %v996_v57  ;;  %vm998_vm5 = vcmp.ge.f32.partialorder %v996_v57, 0.0  ;;  %v1001_v33 = vsel %vm999_vm4, 1.0, %v1456_v32 }
 0x8f4   :  { %v1005_v59 = vmul.f32 0.3275911, %v1003_v1  ;;  %v1031_v63 = vsub.f32 0.0, %v1003_v1  ;;  %v1000_v36 = vsel %vm998_vm5, 1.0, %v1456_v32 }
 0x8f5   :  { %v1004_v60 = vmul.f32 0.3275911, %v1002_v58  ;;  %v1030_v2 = vsub.f32 0.0, %v1002_v58 }
 0x8f6   :  { %v1007_v61 = vadd.f32 1.0, %v1005_v59  ;;  %v1033_v4 = vmul.f32 %v1031_v63, %v1003_v1 }
 0x8f7   :  { %v1006_v62 = vadd.f32 1.0, %v1004_v60  ;;  %v1032_v7 = vmul.f32 %v1030_v2, %v1002_v58 }
 0x8f8   :  { %1416 = vrcp.f32 %v1007_v61  ;;  %v1036_v10 = vmul.f32 1.442695, %v1033_v4 }
 0x8f9   :  { %1418 = vrcp.f32 %v1006_v62  ;;  %v1034_v13 = vmul.f32 1.442695, %v1032_v7 }
 0x8fa   :  { %1420 = vpow2.f32 %v1036_v10 }
 0x8fb   :  { %1422 = vpow2.f32 %v1034_v13 }
 0x902   :  { %v1417_v3 = vpop.eup %1416 }
 0x903   :  { %v1419_v5 = vpop.eup %1418  ;;  %v1013_v6 = vmul.f32 1.0614054, %v1417_v3 }
 0x904   :  { %v1012_v8 = vmul.f32 1.0614054, %v1419_v5  ;;  %v1421_v26 = vpop.eup %1420 }
 0x905   :  { %v1015_v9 = vadd.f32 -1.4531521, %v1013_v6  ;;  %v1423_v28 = vpop.eup %1422 }
 0x906   :  { %v1014_v11 = vadd.f32 -1.4531521, %v1012_v8 }
 0x907   :  { %v1017_v12 = vmul.f32 %v1417_v3, %v1015_v9 }
 0x908   :  { %v1016_v14 = vmul.f32 %v1419_v5, %v1014_v11 }
 0x909   :  { %v1019_v15 = vadd.f32 1.4214138, %v1017_v12 }
 0x90a   :  { %v1018_v16 = vadd.f32 1.4214138, %v1016_v14 }
 0x90b   :  { %v1021_v17 = vmul.f32 %v1417_v3, %v1019_v15 }
 0x90c   :  { %v1020_v18 = vmul.f32 %v1419_v5, %v1018_v16 }
 0x90d   :  { %v1023_v19 = vadd.f32 -0.28449672, %v1021_v17 }
 0x90e   :  { %v1022_v20 = vadd.f32 -0.28449672, %v1020_v18 }
 0x90f   :  { %v1025_v21 = vmul.f32 %v1417_v3, %v1023_v19 }
 0x910   :  { %v1024_v22 = vmul.f32 %v1419_v5, %v1022_v20 }
 0x911   :  { %v1027_v23 = vadd.f32 0.2548296, %v1025_v21 }
 0x912   :  { %v1026_v24 = vadd.f32 0.2548296, %v1024_v22 }
 0x913   :  { %v1029_v25 = vmul.f32 %v1417_v3, %v1027_v23 }
 0x914   :  { %v1028_v27 = vmul.f32 %v1419_v5, %v1026_v24 }
 0x915   :  { %v1039_v29 = vmul.f32 %v1421_v26, %v1029_v25 }
 0x916   :  { %v1038_v30 = vmul.f32 %v1423_v28, %v1028_v27 }
 0x917   :  { %v1041_v31 = vsub.f32 1.0, %v1039_v29 }
 0x918   :  { %v1040_v34 = vsub.f32 1.0, %v1038_v30 }
 0x919   :  { %v1043_v35 = vmul.f32 %v1041_v31, %v1001_v33 }
 0x91a   :  { %v1042_v37 = vmul.f32 %v1040_v34, %v1000_v36 }
 0x91b   :  { %v1045_v38 = vadd.f32 1.0, %v1043_v35 }
 0x91c   :  { %v1044_v40 = vadd.f32 1.0, %v1042_v37 }
 0x91d   :  { %v1047_v43 = vmul.f32 %v1045_v38, %v995_v41 }
 0x91e   :  { %v1046_v42 = vmul.f32 %v1044_v40, %v994_v39 }
 0x920   :  { %1329 = vmatprep.mubr.f32.mxu1 %v1046_v42 }
 0x921   :  { %1330 = vmatmul.mubr.f32.vlgmr.msra.gmra.mrb[4].mxu1 %v1047_v43 }
 0x9f4   :  { %v1331_v45 = vpop.f32.mrb[4].mxu1 }
 0x9f5   :  { %v1143_v46 = vadd.f32 %v1331_v45, %v1188_v44  ;;  %v1137_v47 = vpop.f32.mrb[5].mxu1 }
 0x9f6   :  { %v1138_v49 = vadd.f32 %v1188_v44, %v1137_v47 }
 0x9f7   :  { %v1147_v50 = vadd.f32 %v1143_v46, %v1635_v53 }
 0x9f8   :  { %v1146_v51 = vadd.f32 %v1138_v49, %v1627_v48 }
 0x9f9   :  { %1149 = vst.msk [vmem:[#allocation2 + $0x8] sm:$0xff] %vm43_vm0, %v1147_v50 }
 0x9fa   :  { %1148 = vst.msk [vmem:[#allocation2] sm:$0xff] %vm43_vm0, %v1146_v51 }
 0x9fb   :  { %1435 = shalt.err (!%p1432_p4)
}
 0x9fc   :  { %s1436_s13 = scalar_lea.hbm %s1746_s11, 256 }
 0x9fd   :  { %p1437_p5 = scmp.ne.s32.totalorder %s1746_s11, %s1436_s13  ;;  %p1440_p6 = scmp.lt.u32.totalorder %s1436_s13, %s1746_s11 }
 0x9ff   :  { %p1442_p7 = pnand %p1440_p6, %p1437_p5 }
 0xa01   :  { %1445 = shalt.err (!%p1442_p7)
}
 0xa02   :  { %s1458_s18 = smov 128   ;;  %s1459_s19 = smov 8  }
 0xa03   :  { %1161 = dma.vmem_to_hbm [thread:$0]  %s1156_s2, 256, %s1746_s11, [#allocation3], %s1458_s18, %s1458_s18, %s1459_s19  }
 0xa04   :  { %1446 = dma.done.wait [#allocation3], 256  }
 0xa05   :  { %1447 = vsyncadd [#allocation3], 4294967040 }
 0xa06   :  { %1165 = vsyncpa [#allocation3], 1 }

</bundles_post_ra>
